<compile_context>
chip_gen: v5e
topology: v5e:2x2
jax: 0.10.0
libtpu: 0.0.40
codegen_flags: <defaults>
</compile_context>

<pallas_src>
import jax
import jax.numpy as jnp
from jax.experimental import pallas as pl
from jax.experimental.pallas import tpu as pltpu


def _round_up(v, m):
    return (v + m - 1) // m * m


def _cdiv(a, b):
    return -(-a // b)


def _tpu_arch_params():
    """(lane_align, vmem_capacity_bytes, vmem_budget_bytes) for the local chip."""
    kind = ""
    try:
        kind = jax.devices()[0].device_kind.lower()
    except Exception:
        pass
    # MXU is 128x128 through v5; 256x256 on v6e/v7x.
    lane = 128 if any(g in kind for g in ("v2", "v3", "v4", "v5")) else 256
    vmem_cap = 0
    try:
        vmem_cap = int(pltpu.get_tpu_info().vmem_capacity_bytes)
    except Exception:
        vmem_cap = 0
    if vmem_cap <= 0:
        vmem_cap = (64 << 20) if ("v7" in kind or "7x" in kind) else (128 << 20)
    # Leave headroom for compiler-internal scratch / pipeline bookkeeping.
    vmem_budget = min(vmem_cap - (16 << 20), int(vmem_cap * 0.85))
    return lane, vmem_cap, vmem_budget


# ---------------------------------------------------------------------------
# Kernels
# ---------------------------------------------------------------------------
def _fused_kernel(x_ref, w_ref, b_ref, o_ref):
    """Weight-resident path: full contraction in one MXU pass, grid=(n_b,).

    x_ref: (TB, D_pad); w_ref: (C_pad, D_pad) in PyTorch (nclass, D) layout;
    b_ref: (1, C_pad) f32; o_ref: (TB, C_pad) f32.
    """
    # NT contraction on the shared feature axis == x @ W^T (no weight transpose
    # materialized).  TODO(synk): verify via bundle dump that Mosaic feeds the
    # (C_pad, TD) block to the MXU without a per-tile vxpose; if not,
    # pre-transpose W once in the wrapper instead.
    logits = jax.lax.dot_general(
        x_ref[...], w_ref[...],
        dimension_numbers=(((1,), (1,)), ((), ())),
        preferred_element_type=jnp.float32) + b_ref[...]
    m = jnp.max(logits, axis=-1, keepdims=True)
    shifted = logits - m
    lse = jnp.log(jnp.sum(jnp.exp(shifted), axis=-1, keepdims=True))
    o_ref[...] = (shifted - lse).astype(o_ref.dtype)


def _ktiled_kernel(x_ref, w_ref, b_ref, o_ref):
    """K-tiled path: accumulate straight into the resident f32 output block."""
    k = pl.program_id(1)

    @pl.when(k == 0)
    def _():
        o_ref[...] = jnp.zeros_like(o_ref)

    o_ref[...] += jax.lax.dot_general(
        x_ref[...], w_ref[...],
        dimension_numbers=(((1,), (1,)), ((), ())),
        preferred_element_type=jnp.float32)

    @pl.when(k == pl.num_programs(1) - 1)
    def _():
        logits = o_ref[...] + b_ref[...]
        m = jnp.max(logits, axis=-1, keepdims=True)
        shifted = logits - m
        lse = jnp.log(jnp.sum(jnp.exp(shifted), axis=-1, keepdims=True))
        o_ref[...] = (shifted - lse).astype(o_ref.dtype)


# ---------------------------------------------------------------------------
# Wrapper
# ---------------------------------------------------------------------------
def linear_logsoftmax(x, weight, bias, *, block_b=256, block_d=1024,
                      compute_dtype=None, k_tile=None):
    """log_softmax(x @ weight.T + bias, axis=1) — LINEAR_LOGSOFTMAX forward.

    x: (B, D); weight: (C, D) (nn.Linear layout); bias: (C,).
    compute_dtype: optional low-precision MXU operand dtype (e.g. jnp.bfloat16);
      accumulation, bias add and the log-softmax epilogue stay f32.
    k_tile: force a contraction tile size (mainly to exercise the K-tiled path).
    """
    B, D = x.shape
    C, Dw = weight.shape
    assert Dw == D and bias.shape == (C,)

    lane, _vmem_cap, vmem_budget = _tpu_arch_params()

    in_dtype = jnp.dtype(compute_dtype) if compute_dtype is not None else jnp.dtype(jnp.float32)
    xb = in_dtype.itemsize
    tb_align = max(8, 32 // xb)          # (8,128) tiles for f32, (16,128) for bf16

    # ---- class axis: lane-dense, MXU-N aligned ------------------------------
    C_pad = _round_up(max(C, lane), lane)

    # ---- batch tiling: minimize padding; >=2 tiles for big-enough B so a
    #      dual-TensorCore chip (v7x) keeps both cores busy ---------------------
    n_b = max(1, _cdiv(B, block_b))
    if n_b == 1 and B >= 128:
        n_b = 2
    TB = _round_up(_cdiv(B, n_b), tb_align)

    def vmem_need(tb, td):
        return (2 * tb * td * xb          # x tile (double buffered)
                + 2 * C_pad * td * xb     # W tile (double buffered)
                + 2 * C_pad * 4           # bias
                + 2 * tb * C_pad * 4)     # f32 output block (also the accumulator)

    # ---- contraction axis: keep the whole weight resident whenever it fits ---
    D_full = _round_up(D, lane)
    if k_tile is None and vmem_need(TB, D_full) <= vmem_budget:
        TD, D_pad, n_k = D_full, D_full, 1
    else:
        TD = _round_up(min(k_tile if k_tile is not None else block_d, D_full), lane)
        # Shrink tiles against the budget instead of only clamping the limit.
        while vmem_need(TB, TD) > vmem_budget and TD > lane:
            TD = max(lane, (TD // 2) // lane * lane)
        while vmem_need(TB, TD) > vmem_budget and TB > tb_align:
            TB = max(tb_align, _round_up(TB // 2, tb_align))
        # TODO(synk): vocab-sized C (un-tiled class axis) can still exceed VMEM;
        # that needs class-axis tiling with a two-pass / online log-softmax.
        D_pad = _round_up(D, TD)          # pad D UP; zero feature columns are inert
        n_k = D_pad // TD
        n_b = max(1, _cdiv(B, TB))        # TB may have shrunk

    B_pad = n_b * TB

    # ---- pad operands: zero feature/batch padding is inert; padded classes get
    #      zero weight rows and a very negative bias so exp(.) == 0. ------------
    xp = x.astype(jnp.float32)
    if (B_pad, D_pad) != (B, D):
        xp = jnp.pad(xp, ((0, B_pad - B), (0, D_pad - D)))
    wp = weight.astype(jnp.float32)
    if (C_pad, D_pad) != (C, D):
        wp = jnp.pad(wp, ((0, C_pad - C), (0, D_pad - D)))
    bp = jnp.pad(bias.astype(jnp.float32), (0, C_pad - C),
                 constant_values=-1e30).reshape(1, C_pad)
    xp = xp.astype(in_dtype)
    wp = wp.astype(in_dtype)

    vmem_limit = int(min(max(vmem_need(TB, TD) * 5 // 4, 32 << 20), vmem_budget))

    w_reads = n_b if n_k > 1 else 1       # weight re-fetched per batch tile only when K-tiled
    cost = pl.CostEstimate(
        flops=2 * B_pad * D_pad * C_pad,
        transcendentals=B_pad * C_pad,
        bytes_accessed=(B_pad * D_pad * xb
                        + w_reads * C_pad * D_pad * xb
                        + C_pad * 4
                        + B_pad * C_pad * 4))

    out_shape = jax.ShapeDtypeStruct((B_pad, C_pad), jnp.float32)

    if n_k == 1:
        grid_spec = pltpu.PrefetchScalarGridSpec(
            num_scalar_prefetch=0,
            grid=(n_b,),
            in_specs=[
                pl.BlockSpec((TB, TD), lambda i: (i, 0)),        # x tile
                pl.BlockSpec((C_pad, TD), lambda i: (0, 0)),     # W: resident, DMA'd once
                pl.BlockSpec((1, C_pad), lambda i: (0, 0)),      # bias
            ],
            out_specs=pl.BlockSpec((TB, C_pad), lambda i: (i, 0)),
        )
        kernel = _fused_kernel
        dims = ("parallel",)
    else:
        grid_spec = pltpu.PrefetchScalarGridSpec(
            num_scalar_prefetch=0,
            grid=(n_b, n_k),                                     # reduction axis last
            in_specs=[
                pl.BlockSpec((TB, TD), lambda i, k: (i, k)),     # x tile
                pl.BlockSpec((C_pad, TD), lambda i, k: (0, k)),  # W K-slab
                pl.BlockSpec((1, C_pad), lambda i, k: (0, 0)),   # bias
            ],
            out_specs=pl.BlockSpec((TB, C_pad), lambda i, k: (i, 0)),
        )
        kernel = _ktiled_kernel
        dims = ("parallel", "arbitrary")

    out = pl.pallas_call(
        kernel,
        out_shape=out_shape,
        grid_spec=grid_spec,
        compiler_params=pltpu.CompilerParams(
            dimension_semantics=dims,
            vmem_limit_bytes=vmem_limit),
        cost_estimate=cost,
    )(xp, wp, bp)

    return out[:B, :C]


if __name__ == "__main__":
    def make_case(key, batch, input_dim, nclass):
        k_x, k_w, k_b = jax.random.split(key, 3)
        bound = 1.0 / jnp.sqrt(jnp.float32(input_dim))
        x = jax.random.normal(k_x, (batch, input_dim), dtype=jnp.float32)
        w = jax.random.uniform(k_w, (nclass, input_dim), dtype=jnp.float32,
                               minval=-bound, maxval=bound)
        b = jax.random.uniform(k_b, (nclass,), dtype=jnp.float32,
                               minval=-bound, maxval=bound)
        return x, w, b

    # 1) spec-sized case: batch=8, input_dim=32, nclass=16 (weight-resident path)
    x, w, b = make_case(jax.random.PRNGKey(0), 8, 32, 16)
    out = jax.block_until_ready(linear_logsoftmax(x, w, b))
    ref = jax.nn.log_softmax(x @ w.T + b, axis=1)
    assert out.shape == (8, 16)
    assert jnp.allclose(out, ref, atol=1e-5, rtol=1e-5), "mismatch (small case)"

    # 2) exercises batch tiling + weight residency + class-axis padding
    x2, w2, b2 = make_case(jax.random.PRNGKey(1), 300, 1024, 20)
    ref2 = jax.nn.log_softmax(x2 @ w2.T + b2, axis=1)
    out2 = jax.block_until_ready(linear_logsoftmax(x2, w2, b2))
    assert out2.shape == (300, 20)
    assert jnp.allclose(out2, ref2, atol=1e-4, rtol=1e-4), "mismatch (tiled case)"

    # 3) forced K-tiling: exercises the accumulate-into-output reduction path
    out3 = jax.block_until_ready(linear_logsoftmax(x2, w2, b2, k_tile=256))
    assert jnp.allclose(out3, ref2, atol=1e-4, rtol=1e-4), "mismatch (K-tiled case)"

    # 4) bf16 MXU operands with f32 accumulation / epilogue
    out4 = jax.block_until_ready(
        linear_logsoftmax(x2, w2, b2, compute_dtype=jnp.bfloat16))
    assert jnp.allclose(out4, ref2, atol=2e-2, rtol=2e-2), "mismatch (bf16 case)"

    print("KERNEL_OK")
</pallas_src>

<mosaic_0001>
module attributes {stable_mosaic.version = 11 : i64} {
  func.func @_fused_kernel(%arg0: i32, %arg1: memref<8x256xf32, #tpu.memory_space<vmem>>, %arg2: memref<256x256xf32, #tpu.memory_space<vmem>>, %arg3: memref<1x256xf32, #tpu.memory_space<vmem>>, %arg4: memref<8x256xf32, #tpu.memory_space<vmem>>) attributes {dimension_semantics = [#tpu.dimension_semantics<parallel>], iteration_bounds = array<i64: 1>, scalar_prefetch = 0 : i64, scratch_operands = 0 : i64, tpu.core_type = #tpu.core_type<tc>, window_params = [{transform_indices = @transform_0, window_bounds = array<i64: 8, 256>}, {pipeline_mode = #tpu.pipeline_mode<synchronous>, transform_indices = @transform_1, window_bounds = array<i64: 256, 256>}, {pipeline_mode = #tpu.pipeline_mode<synchronous>, transform_indices = @transform_2, window_bounds = array<i64: 1, 256>}, {transform_indices = @transform_3, window_bounds = array<i64: 8, 256>}]} {
    %c0 = arith.constant 0 : index
    %c0_0 = arith.constant 0 : index
    %0 = vector.load %arg1[%c0, %c0_0] : memref<8x256xf32, #tpu.memory_space<vmem>>, vector<8x256xf32>
    %c0_1 = arith.constant 0 : index
    %c0_2 = arith.constant 0 : index
    %1 = vector.load %arg2[%c0_1, %c0_2] : memref<256x256xf32, #tpu.memory_space<vmem>>, vector<256x256xf32>
    %cst = arith.constant dense<0.000000e+00> : vector<8x256xf32>
    %2 = tpu.matmul %0, %1, %cst {dimension_numbers = #tpu.dot_dimension_numbers<[1], [1], [0], [0], [0, 0, 1, 0], [], []>} : vector<8x256xf32>, vector<256x256xf32>, vector<8x256xf32> -> vector<8x256xf32>
    %c0_3 = arith.constant 0 : index
    %c0_4 = arith.constant 0 : index
    %3 = vector.load %arg3[%c0_3, %c0_4] : memref<1x256xf32, #tpu.memory_space<vmem>>, vector<1x256xf32>
    %4 = vector.broadcast %3 : vector<1x256xf32> to vector<8x256xf32>
    %5 = arith.addf %2, %4 : vector<8x256xf32>
    %cst_5 = arith.constant dense<0xFF800000> : vector<8xf32>
    %6 = vector.multi_reduction <maximumf>, %5, %cst_5 [1] : vector<8x256xf32> to vector<8xf32>
    %7 = vector.shape_cast %6 : vector<8xf32> to vector<8x1xf32>
    %8 = vector.broadcast %7 : vector<8x1xf32> to vector<8x256xf32>
    %9 = arith.subf %5, %8 : vector<8x256xf32>
    %10 = math.exp %9 : vector<8x256xf32>
    %cst_6 = arith.constant dense<0.000000e+00> : vector<8xf32>
    %11 = vector.multi_reduction <add>, %10, %cst_6 [1] : vector<8x256xf32> to vector<8xf32>
    %12 = vector.shape_cast %11 : vector<8xf32> to vector<8x1xf32>
    %13 = math.log %12 : vector<8x1xf32>
    %14 = vector.broadcast %13 : vector<8x1xf32> to vector<8x256xf32>
    %15 = arith.subf %9, %14 : vector<8x256xf32>
    %c0_7 = arith.constant 0 : index
    %c0_8 = arith.constant 0 : index
    %16 = vector.load %arg4[%c0_7, %c0_8] : memref<8x256xf32, #tpu.memory_space<vmem>>, vector<8x256xf32>
    tpu.vector_store %arg4[%c0_7, %c0_8], %15 {strides = array<i32>} : memref<8x256xf32, #tpu.memory_space<vmem>>, vector<8x256xf32>,
    return
  }
  func.func @transform_0(%arg0: i32) -> (i32, i32) {
    %c0_i32 = arith.constant 0 : i32
    %c0_i32_0 = arith.constant 0 : i32
    return %arg0, %c0_i32 : i32, i32
  }
  func.func @transform_1(%arg0: i32) -> (i32, i32) {
    %c0_i32 = arith.constant 0 : i32
    %c0_i32_0 = arith.constant 0 : i32
    %c0_i32_1 = arith.constant 0 : i32
    return %c0_i32, %c0_i32_0 : i32, i32
  }
  func.func @transform_2(%arg0: i32) -> (i32, i32) {
    %c0_i32 = arith.constant 0 : i32
    %c0_i32_0 = arith.constant 0 : i32
    %c0_i32_1 = arith.constant 0 : i32
    return %c0_i32, %c0_i32_0 : i32, i32
  }
  func.func @transform_3(%arg0: i32) -> (i32, i32) {
    %c0_i32 = arith.constant 0 : i32
    %c0_i32_0 = arith.constant 0 : i32
    return %arg0, %c0_i32 : i32, i32
  }
}

</mosaic_0001>

<bundles_post_ra>
// kernel: tpu_custom_call.1
= control target key start
LH: loop header
LB: loop body
LE: loop exit
PB: predicated region body
PF: predicated region fallthrough
CT: control target
= control target key end

     0   :  { %8 = vsyncpa [#allocation3], 0  ;;  %s398_s0 = inlined_call_operand.hbm [shape: f32[8,256], index: 0, kind: input, shape index: {}]   ;;  %s399_s1 = inlined_call_operand.hbm [shape: f32[256,256], index: 1, kind: input, shape index: {}]   ;;  %s400_s2 = inlined_call_operand.hbm [shape: f32[1,256], index: 2, kind: input, shape index: {}]   ;;  %s401_s3 = inlined_call_operand.hbm [shape: f32[8,256], index: 3, kind: output, shape index: {}]  }
   0x1   :  { %9 = vsyncpa [#allocation6], 0  ;;  %s26_s14 = sshll.u32 %s399_s1, 4  ;;  %s27_s14 = int_to_ptr.hbm [resolvable:$true] %s26_s14 }
   0x2   :  { %10 = vsyncpa [#allocation4], 0  ;;  %s360_s15 = smov [#allocation5]   ;;  %s16_s19 = sshll.u32 %s398_s0, 4  ;;  %s17_s19 = int_to_ptr.hbm [resolvable:$true] %s16_s19 }
   0x3   :  { %s28_s16 = sshll.u32 %s360_s15, 4  ;;  %s361_s20 = smov 256   ;;  %s29_s16 = int_to_ptr.vmem [resolvable:$true] %s28_s16 }
   0x4   :  { %s362_s21 = smov 16   ;;  %s363_s22 = smov [#allocation2]  }
   0x5   :  { %34 = dma.hbm_to_vmem [thread:$0]  %s27_s14, 8192, %s29_s16, [#allocation6], %s361_s20, %s361_s20, %s362_s21  }
   0x6   :  { %s18_s23 = sshll.u32 %s363_s22, 4  ;;  %s40_s26 = sshll.u32 %s400_s2, 4  ;;  %s19_s23 = int_to_ptr.vmem [resolvable:$true] %s18_s23  ;;  %s41_s26 = int_to_ptr.hbm [resolvable:$true] %s40_s26 }
   0x7   :  { %21 = dma.hbm_to_vmem [thread:$0]  %s17_s19, 256, %s19_s23, [#allocation3]  }
   0x8   :  { %s364_s1 = smov [#allocation7]  }
   0x9   :  { %s42_s27 = sshll.u32 %s364_s1, 4  ;;  %s43_s27 = int_to_ptr.vmem [resolvable:$true] %s42_s27 }
   0xa   :  { %45 = dma.hbm_to_vmem [thread:$0]  %s41_s26, 32, %s43_s27, [#allocation6]  }
   0xb   :  { %354 = dma.done.wait [#allocation3], 256  }
   0xc   :  { %355 = vsyncadd [#allocation3], 4294967040 }
   0xd   :  { %356 = dma.done.wait [#allocation6], 8224  }
   0xe   :  { %357 = vsyncadd [#allocation6], 4294959072  ;;  %v122_v0 = vld [vmem:[#allocation5 + $0x1f0] sm:$0xff]  ;;  %v123_v1 = vld [vmem:[#allocation5 + $0x1f8] sm:$0xff]  ;;  %s365_s0 = smov [#allocation8]   ;;  %s235_s30 = sshll.u32 %s401_s3, 4  ;;  %s236_s30 = int_to_ptr.hbm [resolvable:$true] %s235_s30 }
   0xf   :  { %170 = vmatpush.xpose.msra.mxu2 %v122_v0  ;;  %190 = vmatpush.xpose.msra.mxu3 %v123_v1  ;;  %v90_v2 = vld [vmem:[#allocation5 + $0xf0] sm:$0xff]  ;;  %v91_v3 = vld [vmem:[#allocation5 + $0xf8] sm:$0xff]  ;;  %v120_v4 = vld [vmem:[#allocation5 + $0x1e0] sm:$0xff]  ;;  %s233_s2 = sshll.u32 %s365_s0, 4  ;;  %s234_s2 = int_to_ptr.vmem [resolvable:$true] %s233_s2 }
  0x10   :  { %130 = vmatpush.xpose.msra.mxu0 %v90_v2  ;;  %v121_v5 = vld [vmem:[#allocation5 + $0x1e8] sm:$0xff]  ;;  %150 = vmatpush.xpose.msra.mxu1 %v91_v3  ;;  %v88_v6 = vld [vmem:[#allocation5 + $0xe0] sm:$0xff]  ;;  %v118_v8 = vld [vmem:[#allocation5 + $0x1d0] sm:$0xff] }
  0x11   :  { %v89_v7 = vld [vmem:[#allocation5 + $0xe8] sm:$0xff]  ;;  %v119_v9 = vld [vmem:[#allocation5 + $0x1d8] sm:$0xff]  ;;  %v86_v10 = vld [vmem:[#allocation5 + $0xd0] sm:$0xff] }
  0x12   :  { %v87_v11 = vld [vmem:[#allocation5 + $0xd8] sm:$0xff]  ;;  %v116_v12 = vld [vmem:[#allocation5 + $0x1c0] sm:$0xff]  ;;  %v117_v13 = vld [vmem:[#allocation5 + $0x1c8] sm:$0xff] }
  0x13   :  { %171 = vmatpush.xpose.msra.mxu2 %v120_v4  ;;  %191 = vmatpush.xpose.msra.mxu3 %v121_v5  ;;  %v84_v14 = vld [vmem:[#allocation5 + $0xc0] sm:$0xff]  ;;  %v85_v15 = vld [vmem:[#allocation5 + $0xc8] sm:$0xff]  ;;  %v114_v16 = vld [vmem:[#allocation5 + $0x1b0] sm:$0xff] }
  0x14   :  { %131 = vmatpush.xpose.msra.mxu0 %v88_v6  ;;  %151 = vmatpush.xpose.msra.mxu1 %v89_v7  ;;  %v115_v17 = vld [vmem:[#allocation5 + $0x1b8] sm:$0xff]  ;;  %v82_v18 = vld [vmem:[#allocation5 + $0xb0] sm:$0xff]  ;;  %v112_v20 = vld [vmem:[#allocation5 + $0x1a0] sm:$0xff] }
  0x15   :  { %v83_v19 = vld [vmem:[#allocation5 + $0xb8] sm:$0xff]  ;;  %v113_v21 = vld [vmem:[#allocation5 + $0x1a8] sm:$0xff]  ;;  %v80_v22 = vld [vmem:[#allocation5 + $0xa0] sm:$0xff] }
  0x16   :  { %v81_v23 = vld [vmem:[#allocation5 + $0xa8] sm:$0xff]  ;;  %v110_v24 = vld [vmem:[#allocation5 + $0x190] sm:$0xff]  ;;  %v111_v25 = vld [vmem:[#allocation5 + $0x198] sm:$0xff] }
  0x17   :  { %172 = vmatpush.xpose.msra.mxu2 %v118_v8  ;;  %192 = vmatpush.xpose.msra.mxu3 %v119_v9  ;;  %v78_v26 = vld [vmem:[#allocation5 + $0x90] sm:$0xff]  ;;  %v79_v27 = vld [vmem:[#allocation5 + $0x98] sm:$0xff]  ;;  %v108_v28 = vld [vmem:[#allocation5 + $0x180] sm:$0xff] }
  0x18   :  { %132 = vmatpush.xpose.msra.mxu0 %v86_v10  ;;  %152 = vmatpush.xpose.msra.mxu1 %v87_v11  ;;  %v109_v29 = vld [vmem:[#allocation5 + $0x188] sm:$0xff]  ;;  %v76_v30 = vld [vmem:[#allocation5 + $0x80] sm:$0xff]  ;;  %v106_v32 = vld [vmem:[#allocation5 + $0x170] sm:$0xff] }
  0x19   :  { %v77_v31 = vld [vmem:[#allocation5 + $0x88] sm:$0xff]  ;;  %v107_v33 = vld [vmem:[#allocation5 + $0x178] sm:$0xff]  ;;  %v74_v34 = vld [vmem:[#allocation5 + $0x70] sm:$0xff] }
  0x1a   :  { %v75_v35 = vld [vmem:[#allocation5 + $0x78] sm:$0xff]  ;;  %v104_v36 = vld [vmem:[#allocation5 + $0x160] sm:$0xff]  ;;  %v105_v37 = vld [vmem:[#allocation5 + $0x168] sm:$0xff] }
  0x1b   :  { %173 = vmatpush.xpose.msra.mxu2 %v116_v12  ;;  %193 = vmatpush.xpose.msra.mxu3 %v117_v13  ;;  %v72_v38 = vld [vmem:[#allocation5 + $0x60] sm:$0xff]  ;;  %v73_v39 = vld [vmem:[#allocation5 + $0x68] sm:$0xff]  ;;  %v102_v40 = vld [vmem:[#allocation5 + $0x150] sm:$0xff] }
  0x1c   :  { %133 = vmatpush.xpose.msra.mxu0 %v84_v14  ;;  %153 = vmatpush.xpose.msra.mxu1 %v85_v15  ;;  %v103_v41 = vld [vmem:[#allocation5 + $0x158] sm:$0xff]  ;;  %v70_v42 = vld [vmem:[#allocation5 + $0x50] sm:$0xff]  ;;  %v100_v44 = vld [vmem:[#allocation5 + $0x140] sm:$0xff] }
  0x1d   :  { %v71_v43 = vld [vmem:[#allocation5 + $0x58] sm:$0xff]  ;;  %v101_v45 = vld [vmem:[#allocation5 + $0x148] sm:$0xff]  ;;  %v68_v46 = vld [vmem:[#allocation5 + $0x40] sm:$0xff] }
  0x1e   :  { %v69_v47 = vld [vmem:[#allocation5 + $0x48] sm:$0xff]  ;;  %v98_v48 = vld [vmem:[#allocation5 + $0x130] sm:$0xff]  ;;  %v99_v49 = vld [vmem:[#allocation5 + $0x138] sm:$0xff] }
  0x1f   :  { %174 = vmatpush.xpose.msra.mxu2 %v114_v16  ;;  %194 = vmatpush.xpose.msra.mxu3 %v115_v17  ;;  %v66_v50 = vld [vmem:[#allocation5 + $0x30] sm:$0xff]  ;;  %v67_v51 = vld [vmem:[#allocation5 + $0x38] sm:$0xff]  ;;  %v96_v52 = vld [vmem:[#allocation5 + $0x120] sm:$0xff] }
  0x20   :  { %134 = vmatpush.xpose.msra.mxu0 %v82_v18  ;;  %154 = vmatpush.xpose.msra.mxu1 %v83_v19  ;;  %v97_v53 = vld [vmem:[#allocation5 + $0x128] sm:$0xff]  ;;  %v64_v54 = vld [vmem:[#allocation5 + $0x20] sm:$0xff]  ;;  %v94_v56 = vld [vmem:[#allocation5 + $0x110] sm:$0xff] }
  0x21   :  { %v65_v55 = vld [vmem:[#allocation5 + $0x28] sm:$0xff]  ;;  %v95_v57 = vld [vmem:[#allocation5 + $0x118] sm:$0xff]  ;;  %v62_v58 = vld [vmem:[#allocation5 + $0x10] sm:$0xff] }
  0x22   :  { %v63_v59 = vld [vmem:[#allocation5 + $0x18] sm:$0xff]  ;;  %v92_v60 = vld [vmem:[#allocation5 + $0x100] sm:$0xff]  ;;  %v93_v61 = vld [vmem:[#allocation5 + $0x108] sm:$0xff] }
  0x23   :  { %175 = vmatpush.xpose.msra.mxu2 %v112_v20  ;;  %195 = vmatpush.xpose.msra.mxu3 %v113_v21  ;;  %v60_v62 = vld [vmem:[#allocation5] sm:$0xff]  ;;  %v61_v63 = vld [vmem:[#allocation5 + $0x8] sm:$0xff]  ;;  %v58_v0 = vld [vmem:[#allocation2] sm:$0xff] }
  0x24   :  { %135 = vmatpush.xpose.msra.mxu0 %v80_v22  ;;  %155 = vmatpush.xpose.msra.mxu1 %v81_v23  ;;  %v59_v1 = vld [vmem:[#allocation2 + $0x8] sm:$0xff]  ;;  %v124_v2 = vld [vmem:[#allocation7] sm:$0x3] }
  0x25   :  { %v126_v3 = vperm.slane %v124_v2, 0  ;;  %v127_v6 = vperm.slane %v124_v2, 1 }
  0x27   :  { %176 = vmatpush.xpose.msra.mxu2 %v110_v24  ;;  %196 = vmatpush.xpose.msra.mxu3 %v111_v25 }
  0x28   :  { %136 = vmatpush.xpose.msra.mxu0 %v78_v26  ;;  %156 = vmatpush.xpose.msra.mxu1 %v79_v27 }
  0x2b   :  { %177 = vmatpush.xpose.msra.mxu2 %v108_v28  ;;  %197 = vmatpush.xpose.msra.mxu3 %v109_v29 }
  0x2c   :  { %137 = vmatpush.xpose.msra.mxu0 %v76_v30  ;;  %157 = vmatpush.xpose.msra.mxu1 %v77_v31 }
  0x2f   :  { %178 = vmatpush.xpose.msra.mxu2 %v106_v32  ;;  %198 = vmatpush.xpose.msra.mxu3 %v107_v33 }
  0x30   :  { %138 = vmatpush.xpose.msra.mxu0 %v74_v34  ;;  %158 = vmatpush.xpose.msra.mxu1 %v75_v35 }
  0x33   :  { %179 = vmatpush.xpose.msra.mxu2 %v104_v36  ;;  %199 = vmatpush.xpose.msra.mxu3 %v105_v37 }
  0x34   :  { %139 = vmatpush.xpose.msra.mxu0 %v72_v38  ;;  %159 = vmatpush.xpose.msra.mxu1 %v73_v39 }
  0x37   :  { %180 = vmatpush.xpose.msra.mxu2 %v102_v40  ;;  %200 = vmatpush.xpose.msra.mxu3 %v103_v41 }
  0x38   :  { %140 = vmatpush.xpose.msra.mxu0 %v70_v42  ;;  %160 = vmatpush.xpose.msra.mxu1 %v71_v43 }
  0x3b   :  { %181 = vmatpush.xpose.msra.mxu2 %v100_v44  ;;  %201 = vmatpush.xpose.msra.mxu3 %v101_v45 }
  0x3c   :  { %141 = vmatpush.xpose.msra.mxu0 %v68_v46  ;;  %161 = vmatpush.xpose.msra.mxu1 %v69_v47 }
  0x3f   :  { %182 = vmatpush.xpose.msra.mxu2 %v98_v48  ;;  %202 = vmatpush.xpose.msra.mxu3 %v99_v49 }
  0x40   :  { %142 = vmatpush.xpose.msra.mxu0 %v66_v50  ;;  %162 = vmatpush.xpose.msra.mxu1 %v67_v51 }
  0x43   :  { %183 = vmatpush.xpose.msra.mxu2 %v96_v52  ;;  %203 = vmatpush.xpose.msra.mxu3 %v97_v53 }
  0x44   :  { %143 = vmatpush.xpose.msra.mxu0 %v64_v54  ;;  %163 = vmatpush.xpose.msra.mxu1 %v65_v55 }
  0x47   :  { %184 = vmatpush.xpose.msra.mxu2 %v94_v56  ;;  %204 = vmatpush.xpose.msra.mxu3 %v95_v57 }
  0x48   :  { %144 = vmatpush.xpose.msra.mxu0 %v62_v58  ;;  %164 = vmatpush.xpose.msra.mxu1 %v63_v59 }
  0x4b   :  { %185 = vmatpush.xpose.msra.mxu2 %v92_v60  ;;  %205 = vmatpush.xpose.msra.mxu3 %v93_v61 }
  0x4c   :  { %145 = vmatpush.xpose.msra.mxu0 %v60_v62  ;;  %165 = vmatpush.xpose.msra.mxu1 %v61_v63 }
  0x4e   :  { %186 = vmatmul.f32.vlgmr.msra.gmra.mxu2 %v58_v0  ;;  %206 = vmatmul.f32.vlgmr.msra.gmra.mxu3 %v59_v1 }
  0x4f   :  { %146 = vmatmul.f32.vlgmr.msra.gmra.mxu0 %v58_v0  ;;  %166 = vmatmul.f32.vlgmr.msra.gmra.mxu1 %v59_v1 }
  0xcc   :  { %v147_v4 = vpop.f32.mrf.mxu0  ;;  %v167_v7 = vpop.f32.mrf.mxu1 }
  0xcd   :  { %v148_v5 = vadd.f32 %v147_v4, %v126_v3 }
  0xcf   :  { %v168_v11 = vadd.f32 %v167_v7, %v148_v5 }
  0xd1   :  { %v187_v8 = vpop.f32.mrf.mxu2  ;;  %v207_v9 = vpop.f32.mrf.mxu3 }
  0xd2   :  { %v188_v10 = vadd.f32 %v187_v8, %v127_v6 }
  0xd4   :  { %v208_v12 = vadd.f32 %v207_v9, %v188_v10 }
  0xd6   :  { %v210_v13 = vmax.f32 %v168_v11, %v208_v12 }
  0xd8   :  { %211 = vmax.xlane.f32.xlu0 %v210_v13 }
 0x14b   :  { %v212_v14 = vpop.xlane.xlu0 %211 }
 0x14c   :  { %v213_v15 = vsub.f32 %v168_v11, %v212_v14  ;;  %v214_v16 = vsub.f32 %v208_v12, %v212_v14 }
 0x14e   :  { %v215_v17 = vmul.f32 1.442695, %v213_v15  ;;  %v217_v18 = vmul.f32 1.442695, %v214_v16 }
 0x150   :  { %252 = vpow2.f32 %v215_v17 }
 0x151   :  { %254 = vpow2.f32 %v217_v18 }
 0x156   :  { %v253_v19 = vpop.eup %252 }
 0x157   :  { %v255_v20 = vpop.eup %254 }
 0x158   :  { %v219_v21 = vadd.f32 %v255_v20, %v253_v19 }
 0x15a   :  { %220 = vadd.xlane.f32.xlu0 %v219_v21 }
 0x1cd   :  { %v221_v22 = vpop.xlane.xlu0 %220 }
 0x1ce   :  { %256 = vlog2.f32 %v221_v22 }
 0x1d4   :  { %v257_v23 = vpop.eup %256 }
 0x1d5   :  { %v223_v24 = vmul.f32 0.6931472, %v257_v23 }
 0x1d7   :  { %v224_v25 = vsub.f32 %v213_v15, %v223_v24  ;;  %v225_v26 = vsub.f32 %v214_v16, %v223_v24 }
 0x1d9   :  { %226 = vst [vmem:[#allocation8] sm:$0xff] %v224_v25 }
 0x1da   :  { %227 = vst [vmem:[#allocation8 + $0x8] sm:$0xff] %v225_v26 }
 0x1db   :  { %238 = dma.vmem_to_hbm [thread:$0]  %s234_s2, 256, %s236_s30, [#allocation4]  }
 0x1dc   :  { %358 = dma.done.wait [#allocation4], 256  }
 0x1dd   :  { %359 = vsyncadd [#allocation4], 4294967040 }
 0x1de   :  { %243 = vsyncpa [#allocation3], 1 }
 0x1df   :  { %244 = vsyncpa [#allocation6], 1 }
 0x1e0   :  { %245 = vsyncpa [#allocation4], 1 }

</bundles_post_ra>
